<compile_context>
chip_gen: v7x
topology: tpu7x:2x2x1
jax: 0.10.0
libtpu: 0.0.40
codegen_flags: <defaults>
</compile_context>

<pallas_src>
import functools

import jax
import jax.numpy as jnp
import numpy as np
from jax.experimental import pallas as pl
from jax.experimental.pallas import tpu as pltpu


def _ae_loss_kernel(packed_ref, pull_ref, push_ref, *,
                    pull_weight, push_weight, n_pad, chunk, n_chunks):
    """Pull / push loss for a block of IMB images.

    packed_ref : (IMB, 3*N_pad) f32 -- lane-concatenated [tl | br | mask].
    pull_ref, push_ref : (IMB, 128) f32 -- per-image weighted losses broadcast
        across lanes (wrapper reads lane 0).
    """
    imb = packed_ref.shape[0]

    tl = packed_ref[:, 0:n_pad]                   # (IMB, N_pad)
    br = packed_ref[:, n_pad:2 * n_pad]           # (IMB, N_pad)
    mask = packed_ref[:, 2 * n_pad:3 * n_pad]     # (IMB, N_pad), strictly 0/1

    me = (tl + br) * 0.5
    n = jnp.sum(mask, axis=-1, keepdims=True)     # (IMB, 1): n_obj * C

    # ---- pull loss: (tl-me)^2 + (br-me)^2 == 0.5*(tl-br)^2, summed / n ----
    d = tl - br
    pull_sum = jnp.sum(mask * (0.5 * d * d), axis=-1, keepdims=True)
    pull_img = jnp.where(n > 0.0, pull_sum / jnp.maximum(n, 1.0), 0.0)

    # ---- push loss: sum_{i!=j} mask_i mask_j relu(1-|me_i-me_j|) / (n(n-1)) --
    me_row = me[:, None, :]                       # (IMB, 1, N_pad)
    mask_row = mask[:, None, :]                   # (IMB, 1, N_pad)

    def masked_conf_sum(me_c, mk_c):
        # me_c, mk_c : (IMB, chunk) -- the i-side rows of this chunk.
        # One lane->sublane relayout (me_c/mk_c column view), then everything
        # streams on the VPU; reductions use the XLU slot.
        conf = jnp.maximum(1.0 - jnp.abs(me_c[:, :, None] - me_row), 0.0)
        w = mk_c[:, :, None] * mask_row           # pair mask (i-side * j-side)
        s = jnp.sum(conf * w, axis=-1)            # (IMB, chunk)
        return jnp.sum(s, axis=-1, keepdims=True)  # (IMB, 1)

    if n_chunks == 1:
        push_full = masked_conf_sum(me, mask)
    else:
        def body(c, acc):
            start = pl.multiple_of(c * chunk, chunk)
            tl_c = packed_ref[:, pl.ds(start, chunk)]
            br_c = packed_ref[:, pl.ds(n_pad + start, chunk)]
            mk_c = packed_ref[:, pl.ds(2 * n_pad + start, chunk)]
            return acc + masked_conf_sum((tl_c + br_c) * 0.5, mk_c)

        push_full = jax.lax.fori_loop(0, n_chunks, body,
                                      jnp.zeros((imb, 1), jnp.float32))

    # Diagonal entries are relu(1 - 0) * mask_i^2 = mask_i (mask is binary),
    # so they sum to exactly n -- subtract analytically instead of masking.
    push_sum = push_full - n
    denom = n * (n - 1.0)
    push_img = jnp.where(n > 1.0, push_sum / jnp.maximum(denom, 1.0), 0.0)

    # Lane-dense stores (one full vreg per output), wrapper reads lane 0.
    pull_ref[...] = jnp.broadcast_to(pull_img * pull_weight, (imb, 128))
    push_ref[...] = jnp.broadcast_to(push_img * push_weight, (imb, 128))


def associative_embedding_loss(pred, target, tl_coords, br_coords, num_objs,
                               pull_weight=0.25, push_weight=0.25):
    """JAX/Pallas equivalent of AssociativeEmbeddingLoss.forward.

    pred, target : (B, C, H, W) float32 (NCHW, like PyTorch)
    tl_coords    : (B, Kmax, 2) int32 -- [tl_y, tl_x] per (image, object)
    br_coords    : (B, Kmax, 2) int32 -- [br_y, br_x] per (image, object)
    num_objs     : (B,) int32 -- number of valid objects per image
    Returns (pull_all, push_all) scalars (weighted sums over the batch).
    """
    B, C, H, W = pred.shape
    K = tl_coords.shape[1]
    N = K * C
    # Lane-dense padding: pad the (obj, channel) axis to a multiple of 128.
    N_pad = max(128, ((N + 127) // 128) * 128)

    # TODO(synk): fuse this gather into the kernel (memory_space=pl.ANY feature
    # maps + scalar-prefetched coords + per-object DMA) to drop the XLA gather
    # HLO and the HBM round trip for the packed intermediate.
    def gather(feat, coords):
        # feat: (B, C, H, W); coords: (B, K, 2) -> (B, K*C) obj-major, ch-minor
        y = coords[..., 0]
        x = coords[..., 1]
        emb = jax.vmap(lambda f, yy, xx: f[:, yy, xx])(feat, y, x)   # (B, C, K)
        return jnp.transpose(emb, (0, 2, 1)).reshape(B, N)

    tl = gather(pred, tl_coords).astype(jnp.float32)
    br = gather(target, br_coords).astype(jnp.float32)
    obj_mask = jnp.arange(K)[None, :] < num_objs[:, None]
    mask = jnp.repeat(obj_mask, C, axis=1).astype(jnp.float32)        # (B, K*C)

    pad_n = N_pad - N
    if pad_n:
        tl = jnp.pad(tl, ((0, 0), (0, pad_n)))
        br = jnp.pad(br, ((0, 0), (0, pad_n)))
        mask = jnp.pad(mask, ((0, 0), (0, pad_n)))   # padded slots masked out

    # Single contiguous lane-packed input per image: [tl | br | mask].
    packed = jnp.concatenate([tl, br, mask], axis=-1)                 # (B, 3*N_pad)

    # Images per grid step: fill sublanes / amortize the per-step fixed cost.
    # imb must be a multiple of 8 or equal to the full batch extent.
    imb = 8 if B >= 8 else B
    B_pad = ((B + imb - 1) // imb) * imb
    if B_pad != B:
        packed = jnp.pad(packed, ((0, B_pad - B), (0, 0)))  # zero mask -> 0 loss
    n_blocks = B_pad // imb

    # Row-chunk the (imb, chunk, N_pad) confusion slab so live state stays
    # ~<= 2 MiB; default scoped VMEM suffices on v5e/v6e/v7x (no vmem_limit).
    # TODO(synk): for extreme N_pad (>~4K) also split rows over a grid axis.
    budget_bytes = 2 * 1024 * 1024
    max_chunk = max(128, (budget_bytes // (imb * N_pad * 4)) // 128 * 128)
    chunk = min(N_pad, max_chunk)
    while N_pad % chunk:          # pick a multiple of 128 that divides N_pad
        chunk -= 128
    n_chunks = N_pad // chunk

    kernel = functools.partial(_ae_loss_kernel,
                               pull_weight=float(pull_weight),
                               push_weight=float(push_weight),
                               n_pad=N_pad, chunk=chunk, n_chunks=n_chunks)

    in_spec = pl.BlockSpec((imb, 3 * N_pad), lambda b: (b, 0))
    out_spec = pl.BlockSpec((imb, 128), lambda b: (b, 0))

    # TODO(synk): on v7x (2 TCs) with B == 1, add a second "parallel" grid axis
    # over conf row-chunks (partial sums per slot) so both cores get work.
    pull_o, push_o = pl.pallas_call(
        kernel,
        grid=(n_blocks,),
        out_shape=(jax.ShapeDtypeStruct((B_pad, 128), jnp.float32),
                   jax.ShapeDtypeStruct((B_pad, 128), jnp.float32)),
        in_specs=[in_spec],
        out_specs=(out_spec, out_spec),
        compiler_params=pltpu.CompilerParams(
            dimension_semantics=("parallel",)),
    )(packed)

    # Padded batch rows have all-zero mask -> zero loss, safe to sum over all.
    return jnp.sum(pull_o[:, 0]), jnp.sum(push_o[:, 0])


def _reference_ae_loss(pred, target, tl_coords, br_coords, num_objs,
                       pull_weight=0.25, push_weight=0.25):
    """Pure numpy transcription of the PyTorch module for verification."""
    pred = np.asarray(pred)
    target = np.asarray(target)
    tl_coords = np.asarray(tl_coords)
    br_coords = np.asarray(br_coords)
    num_objs = np.asarray(num_objs)
    B = pred.shape[0]
    pull_all, push_all = 0.0, 0.0
    for b in range(B):
        n_obj = int(num_objs[b])
        if n_obj == 0:
            continue
        tl_list, br_list, me_list = [], [], []
        for k in range(n_obj):
            ty, tx = int(tl_coords[b, k, 0]), int(tl_coords[b, k, 1])
            by, bx = int(br_coords[b, k, 0]), int(br_coords[b, k, 1])
            tl_e = pred[b, :, ty, tx]
            br_e = target[b, :, by, bx]
            tl_list.append(tl_e)
            br_list.append(br_e)
            me_list.append((tl_e + br_e) / 2.0)
        tl = np.concatenate(tl_list)
        br = np.concatenate(br_list)
        me = np.concatenate(me_list)
        Nn = tl.shape[0]
        pull = (((tl - me) ** 2) + ((br - me) ** 2)).sum() / Nn
        conf = me[:, None] - me[None, :]
        conf = (1.0 - np.eye(Nn)) * (1.0 - np.abs(conf))
        push = np.maximum(conf, 0.0).sum() / (Nn * (Nn - 1)) if Nn > 1 else 0.0
        pull_all += pull_weight * pull
        push_all += push_weight * push
    return pull_all, push_all


if __name__ == "__main__":
    B, C, H, W, Kmax = 2, 4, 16, 16, 8
    key = jax.random.PRNGKey(0)
    k1, k2, k3, k4 = jax.random.split(key, 4)

    pred = jax.random.normal(k1, (B, C, H, W), dtype=jnp.float32)
    target = jax.random.normal(k2, (B, C, H, W), dtype=jnp.float32)
    tl_coords = jax.random.randint(k3, (B, Kmax, 2), 0, H, dtype=jnp.int32)
    br_coords = jax.random.randint(k4, (B, Kmax, 2), 0, H, dtype=jnp.int32)
    num_objs = jnp.array([5, 2], dtype=jnp.int32)   # valid objects per image

    pull, push = associative_embedding_loss(
        pred, target, tl_coords, br_coords, num_objs,
        pull_weight=0.25, push_weight=0.25)
    pull = jax.block_until_ready(pull)
    push = jax.block_until_ready(push)

    ref_pull, ref_push = _reference_ae_loss(
        pred, target, tl_coords, br_coords, num_objs,
        pull_weight=0.25, push_weight=0.25)

    assert np.allclose(float(pull), ref_pull, rtol=5e-4, atol=1e-5), \
        (float(pull), ref_pull)
    assert np.allclose(float(push), ref_push, rtol=5e-4, atol=1e-5), \
        (float(push), ref_push)
    print("KERNEL_OK")
</pallas_src>

<mosaic_0001>
module attributes {stable_mosaic.version = 11 : i64} {
  func.func @_ae_loss_kernel(%arg0: i32, %arg1: memref<2x384xf32, #tpu.memory_space<vmem>>, %arg2: memref<2x128xf32, #tpu.memory_space<vmem>>, %arg3: memref<2x128xf32, #tpu.memory_space<vmem>>) attributes {dimension_semantics = [#tpu.dimension_semantics<parallel>], iteration_bounds = array<i64: 1>, scalar_prefetch = 0 : i64, scratch_operands = 0 : i64, tpu.core_type = #tpu.core_type<tc>, window_params = [{transform_indices = @transform_0, window_bounds = array<i64: 2, 384>}, {transform_indices = @transform_1, window_bounds = array<i64: 2, 128>}, {transform_indices = @transform_2, window_bounds = array<i64: 2, 128>}]} {
    %c0 = arith.constant 0 : index
    %c0_0 = arith.constant 0 : index
    %0 = vector.load %arg1[%c0, %c0_0] : memref<2x384xf32, #tpu.memory_space<vmem>>, vector<2x128xf32>
    %c0_1 = arith.constant 0 : index
    %c128 = arith.constant 128 : index
    %1 = vector.load %arg1[%c0_1, %c128] : memref<2x384xf32, #tpu.memory_space<vmem>>, vector<2x128xf32>
    %c0_2 = arith.constant 0 : index
    %c256 = arith.constant 256 : index
    %2 = vector.load %arg1[%c0_2, %c256] : memref<2x384xf32, #tpu.memory_space<vmem>>, vector<2x128xf32>
    %3 = arith.addf %0, %1 : vector<2x128xf32>
    %cst = arith.constant 5.000000e-01 : f32
    %4 = vector.broadcast %cst : f32 to vector<2x128xf32>
    %5 = arith.mulf %3, %4 : vector<2x128xf32>
    %cst_3 = arith.constant dense<0.000000e+00> : vector<2xf32>
    %6 = vector.multi_reduction <add>, %2, %cst_3 [1] : vector<2x128xf32> to vector<2xf32>
    %7 = vector.shape_cast %6 : vector<2xf32> to vector<2x1xf32>
    %8 = arith.subf %0, %1 : vector<2x128xf32>
    %cst_4 = arith.constant 5.000000e-01 : f32
    %9 = vector.broadcast %cst_4 : f32 to vector<2x128xf32>
    %10 = arith.mulf %9, %8 : vector<2x128xf32>
    %11 = arith.mulf %10, %8 : vector<2x128xf32>
    %12 = arith.mulf %2, %11 : vector<2x128xf32>
    %cst_5 = arith.constant dense<0.000000e+00> : vector<2xf32>
    %13 = vector.multi_reduction <add>, %12, %cst_5 [1] : vector<2x128xf32> to vector<2xf32>
    %14 = vector.shape_cast %13 : vector<2xf32> to vector<2x1xf32>
    %cst_6 = arith.constant 0.000000e+00 : f32
    %15 = vector.broadcast %cst_6 : f32 to vector<2x1xf32>
    %16 = arith.cmpf ogt, %7, %15 : vector<2x1xf32>
    %cst_7 = arith.constant 1.000000e+00 : f32
    %17 = vector.broadcast %cst_7 : f32 to vector<2x1xf32>
    %18 = arith.maximumf %7, %17 : vector<2x1xf32>
    %19 = arith.divf %14, %18 : vector<2x1xf32>
    %cst_8 = arith.constant 0.000000e+00 : f32
    %20 = vector.broadcast %cst_8 : f32 to vector<2x1xf32>
    %21 = arith.select %16, %19, %20 : vector<2x1xi1>, vector<2x1xf32>
    %22 = vector.shape_cast %5 : vector<2x128xf32> to vector<2x1x128xf32>
    %23 = vector.shape_cast %2 : vector<2x128xf32> to vector<2x1x128xf32>
    %24 = vector.shape_cast %5 : vector<2x128xf32> to vector<2x128x1xf32>
    %25 = vector.broadcast %24 : vector<2x128x1xf32> to vector<2x128x128xf32>
    %26 = vector.broadcast %22 : vector<2x1x128xf32> to vector<2x128x128xf32>
    %27 = arith.subf %25, %26 : vector<2x128x128xf32>
    %28 = math.absf %27 : vector<2x128x128xf32>
    %cst_9 = arith.constant 1.000000e+00 : f32
    %29 = vector.broadcast %cst_9 : f32 to vector<2x128x128xf32>
    %30 = arith.subf %29, %28 : vector<2x128x128xf32>
    %cst_10 = arith.constant 0.000000e+00 : f32
    %31 = vector.broadcast %cst_10 : f32 to vector<2x128x128xf32>
    %32 = arith.maximumf %30, %31 : vector<2x128x128xf32>
    %33 = vector.shape_cast %2 : vector<2x128xf32> to vector<2x128x1xf32>
    %34 = vector.broadcast %33 : vector<2x128x1xf32> to vector<2x128x128xf32>
    %35 = vector.broadcast %23 : vector<2x1x128xf32> to vector<2x128x128xf32>
    %36 = arith.mulf %34, %35 : vector<2x128x128xf32>
    %37 = arith.mulf %32, %36 : vector<2x128x128xf32>
    %cst_11 = arith.constant dense<0.000000e+00> : vector<2x128xf32>
    %38 = vector.multi_reduction <add>, %37, %cst_11 [2] : vector<2x128x128xf32> to vector<2x128xf32>
    %cst_12 = arith.constant dense<0.000000e+00> : vector<2xf32>
    %39 = vector.multi_reduction <add>, %38, %cst_12 [1] : vector<2x128xf32> to vector<2xf32>
    %40 = vector.shape_cast %39 : vector<2xf32> to vector<2x1xf32>
    %41 = arith.subf %40, %7 : vector<2x1xf32>
    %cst_13 = arith.constant 1.000000e+00 : f32
    %42 = vector.broadcast %cst_13 : f32 to vector<2x1xf32>
    %43 = arith.subf %7, %42 : vector<2x1xf32>
    %44 = arith.mulf %7, %43 : vector<2x1xf32>
    %cst_14 = arith.constant 1.000000e+00 : f32
    %45 = vector.broadcast %cst_14 : f32 to vector<2x1xf32>
    %46 = arith.cmpf ogt, %7, %45 : vector<2x1xf32>
    %cst_15 = arith.constant 1.000000e+00 : f32
    %47 = vector.broadcast %cst_15 : f32 to vector<2x1xf32>
    %48 = arith.maximumf %44, %47 : vector<2x1xf32>
    %49 = arith.divf %41, %48 : vector<2x1xf32>
    %cst_16 = arith.constant 0.000000e+00 : f32
    %50 = vector.broadcast %cst_16 : f32 to vector<2x1xf32>
    %51 = arith.select %46, %49, %50 : vector<2x1xi1>, vector<2x1xf32>
    %cst_17 = arith.constant 2.500000e-01 : f32
    %52 = vector.broadcast %cst_17 : f32 to vector<2x1xf32>
    %53 = arith.mulf %21, %52 : vector<2x1xf32>
    %54 = vector.shape_cast %53 : vector<2x1xf32> to vector<2x1xf32>
    %55 = vector.broadcast %54 : vector<2x1xf32> to vector<2x128xf32>
    %c0_18 = arith.constant 0 : index
    %c0_19 = arith.constant 0 : index
    %56 = vector.load %arg2[%c0_18, %c0_19] : memref<2x128xf32, #tpu.memory_space<vmem>>, vector<2x128xf32>
    tpu.vector_store %arg2[%c0_18, %c0_19], %55 {strides = array<i32>} : memref<2x128xf32, #tpu.memory_space<vmem>>, vector<2x128xf32>,
    %cst_20 = arith.constant 2.500000e-01 : f32
    %57 = vector.broadcast %cst_20 : f32 to vector<2x1xf32>
    %58 = arith.mulf %51, %57 : vector<2x1xf32>
    %59 = vector.shape_cast %58 : vector<2x1xf32> to vector<2x1xf32>
    %60 = vector.broadcast %59 : vector<2x1xf32> to vector<2x128xf32>
    %c0_21 = arith.constant 0 : index
    %c0_22 = arith.constant 0 : index
    %61 = vector.load %arg3[%c0_21, %c0_22] : memref<2x128xf32, #tpu.memory_space<vmem>>, vector<2x128xf32>
    tpu.vector_store %arg3[%c0_21, %c0_22], %60 {strides = array<i32>} : memref<2x128xf32, #tpu.memory_space<vmem>>, vector<2x128xf32>,
    return
  }
  func.func @transform_0(%arg0: i32) -> (i32, i32) {
    %c0_i32 = arith.constant 0 : i32
    %c0_i32_0 = arith.constant 0 : i32
    return %arg0, %c0_i32 : i32, i32
  }
  func.func @transform_1(%arg0: i32) -> (i32, i32) {
    %c0_i32 = arith.constant 0 : i32
    %c0_i32_0 = arith.constant 0 : i32
    return %arg0, %c0_i32 : i32, i32
  }
  func.func @transform_2(%arg0: i32) -> (i32, i32) {
    %c0_i32 = arith.constant 0 : i32
    %c0_i32_0 = arith.constant 0 : i32
    return %arg0, %c0_i32 : i32, i32
  }
}

</mosaic_0001>

<bundles_post_ra>
// kernel: tpu_custom_call.1
= control target key start
LH: loop header
LB: loop body
LE: loop exit
PB: predicated region body
PF: predicated region fallthrough
CT: control target
= control target key end

     0   :  { %8 = vsyncpa [#allocation3], 0  ;;  %s1339_s0 = inlined_call_operand.hbm [shape: f32[2,384], index: 0, kind: input, shape index: {}]   ;;  %s1340_s1 = inlined_call_operand.hbm [shape: f32[2,128], index: 1, kind: output, shape index: {0}]   ;;  %s1341_s2 = inlined_call_operand.hbm [shape: f32[2,128], index: 2, kind: output, shape index: {1}]  }
   0x1   :  { %9 = vsyncpa [#allocation4], 0 }
   0x2   :  { %10 = vsyncpa [#allocation7], 0  ;;  %s957_s9 = smov [#allocation2]   ;;  %s885_s13 = scalar_lea.hbm %s1339_s0, 96 }
   0x3   :  { %s17_s10 = sshll.u32 %s957_s9, 4  ;;  %p886_p0 = scmp.ne.s32.totalorder %s1339_s0, %s885_s13  ;;  %s18_s10 = int_to_ptr.vmem [resolvable:$true] %s17_s10 }
   0x4   :  { %p889_p1 = scmp.lt.u32.totalorder %s885_s13, %s1339_s0 }
   0x6   :  { %p891_p2 = pnand %p889_p1, %p886_p0 }
   0x8   :  { %894 = shalt.err (!%p891_p2)
}
   0x9   :  { %s895_s18 = scalar_lea.vmem %s18_s10, 96  ;;  %p900_p4 = scmp.lt.s32.totalorder %s18_s10, %s18_s10 }
   0xa   :  { %p896_p3 = scmp.ne.s32.totalorder %s18_s10, %s895_s18  ;;  %p901_p5 = scmp.lt.s32.totalorder %s895_s18, %s895_s18 }
   0xc   :  { %p902_p6 = por %p901_p5, %p900_p4 }
   0xe   :  { %p903_p7 = pnand %p902_p6, %p896_p3 }
  0x10   :  { %906 = shalt.err (!%p903_p7)
}
  0x11   :  { %20 = dma.hbm_to_vmem [thread:$0]  %s1339_s0, 96, %s18_s10, [#allocation3]  }
  0x12   :  { %951 = dma.done.wait [#allocation3], 96  }
  0x13   :  { %952 = vsyncadd [#allocation3], 4294967200  ;;  %v49_v0 = vlaneseq  ;;  %v958_v1 = vmov 1966171168   ;;  %v991_v5 = vld [vmem:[#allocation2] sm:$0x3] }
  0x14   :  { %v47_v2 = vunpack.c.l.s4 %v958_v1  ;;  %v993_v6 = vld [vmem:[#allocation2 + $0x2] sm:$0x3]  ;;  %v1012_v18 = vld [vmem:[#allocation2 + $0x4] sm:$0x3]  ;;  %vm29_vm0 = vcmask 1041408   ;;  %vm650_vm1 = vcmask 130112  }
  0x15   :  { %v989_v4 = vshrl.u32 %v49_v0, 7  ;;  %v27_v7 = vadd.f32 %v993_v6, %v991_v5  ;;  %vm657_vm2 = vcmask 195712   ;;  %vm664_vm3 = vcmask 261312   ;;  %s959_s0 = smov [#allocation5]  }
  0x16   :  { %v48_v3 = vunpack.c.0.s8 %v47_v2  ;;  %vm671_vm4 = vcmask 326912   ;;  %vm678_vm5 = vcmask 392512   ;;  %vm685_vm6 = vcmask 458112   ;;  %s853_s21 = sshll.u32 %s959_s0, 4  ;;  %s854_s21 = int_to_ptr.vmem [resolvable:$true] %s853_s21 }
  0x17   :  { %v1001_v9 = vsub.s32 0, %v989_v4  ;;  %v132_v10 = vsub.s32 1, %v989_v4  ;;  %v28_v11 = vmul.f32 0.5, %v27_v7  ;;  %vm692_vm7 = vcmask 523712   ;;  %s907_s22 = scalar_lea.vmem %s854_s21, 32  ;;  %p912_p9 = scmp.lt.s32.totalorder %s854_s21, %s854_s21 }
  0x18   :  { %v998_v8 = vsub.s32 %v48_v3, %v989_v4  ;;  %vm699_vm8 = vcmask 589312   ;;  %vm706_vm9 = vcmask 654912   ;;  %vm713_vm10 = vcmask 720512   ;;  %p908_p8 = scmp.ne.s32.totalorder %s854_s21, %s907_s22  ;;  %p913_p10 = scmp.lt.s32.totalorder %s907_s22, %s907_s22 }
  0x19   :  { %v66_v13 = vrot.slane %v28_v11, %v1001_v9  ;;  %v133_v14 = vrot.slane %v28_v11, %v132_v10  ;;  %v338_v19 = vrot.slane %v1012_v18, %v1001_v9  ;;  %v405_v20 = vrot.slane %v1012_v18, %v132_v10 }
  0x1a   :  { %v52_v12 = vrot.slane %v28_v11, %v998_v8  ;;  %v61_v36 = vrot.slane %v1012_v18, %v998_v8  ;;  %vm720_vm11 = vcmask 786112   ;;  %vm727_vm12 = vcmask 851712   ;;  %p914_p11 = por %p913_p10, %p912_p9 }
  0x1b   :  { %135 = vbcast.lane.b32.xlu1 %v133_v14, 256  ;;  %68 = vbcast.lane.b32.xlu0 %v66_v13, 256  ;;  %vm734_vm13 = vcmask 917312   ;;  %vm741_vm14 = vcmask 982912   ;;  %vm748_vm15 = vcmask 1048512  }
  0x1c   :  { %v53_v15 = vcombine.high %v52_v12, %v52_v12  ;;  %v1007_v16 = vrot.slane %v52_v12, %v1001_v9  ;;  %v62_v42 = vcombine.high %v61_v36, %v61_v36  ;;  %v1039_v43 = vrot.slane %v61_v36, %v1001_v9  ;;  %p915_p12 = pnand %p914_p11, %p908_p8 }
  0x1e   :  { %v1010_v17 = vrot.slane %v53_v15, %v1001_v9  ;;  %v1044_v51 = vrot.slane %v62_v42, %v1001_v9 }
  0x1f   :  { %139 = vbcast.lane.b32.xlu1 %v133_v14, 264  ;;  %72 = vbcast.lane.b32.xlu0 %v66_v13, 264 }
  0x23   :  { %143 = vbcast.lane.b32.xlu1 %v133_v14, 272  ;;  %76 = vbcast.lane.b32.xlu0 %v66_v13, 272 }
  0x27   :  { %147 = vbcast.lane.b32.xlu1 %v133_v14, 280  ;;  %80 = vbcast.lane.b32.xlu0 %v66_v13, 280 }
  0x2b   :  { %151 = vbcast.lane.b32.xlu1 %v133_v14, 288  ;;  %84 = vbcast.lane.b32.xlu0 %v66_v13, 288 }
  0x2f   :  { %155 = vbcast.lane.b32.xlu1 %v133_v14, 296  ;;  %88 = vbcast.lane.b32.xlu0 %v66_v13, 296 }
  0x33   :  { %159 = vbcast.lane.b32.xlu1 %v133_v14, 304  ;;  %92 = vbcast.lane.b32.xlu0 %v66_v13, 304 }
  0x37   :  { %163 = vbcast.lane.b32.xlu1 %v133_v14, 312  ;;  %96 = vbcast.lane.b32.xlu0 %v66_v13, 312 }
  0x3b   :  { %344 = vbcast.lane.b32.xlu1 %v338_v19, 264  ;;  %340 = vbcast.lane.b32.xlu0 %v338_v19, 256 }
  0x3f   :  { %411 = vbcast.lane.b32.xlu1 %v405_v20, 264  ;;  %407 = vbcast.lane.b32.xlu0 %v405_v20, 256 }
  0x43   :  { %167 = vbcast.lane.b32.xlu1 %v133_v14, 320  ;;  %100 = vbcast.lane.b32.xlu0 %v66_v13, 320 }
  0x47   :  { %415 = vbcast.lane.b32.xlu1 %v405_v20, 272  ;;  %348 = vbcast.lane.b32.xlu0 %v338_v19, 272 }
  0x4b   :  { %171 = vbcast.lane.b32.xlu1 %v133_v14, 328  ;;  %104 = vbcast.lane.b32.xlu0 %v66_v13, 328 }
  0x4f   :  { %419 = vbcast.lane.b32.xlu1 %v405_v20, 280  ;;  %352 = vbcast.lane.b32.xlu0 %v338_v19, 280 }
  0x53   :  { %175 = vbcast.lane.b32.xlu1 %v133_v14, 336  ;;  %108 = vbcast.lane.b32.xlu0 %v66_v13, 336 }
  0x57   :  { %423 = vbcast.lane.b32.xlu1 %v405_v20, 288  ;;  %356 = vbcast.lane.b32.xlu0 %v338_v19, 288 }
  0x5b   :  { %179 = vbcast.lane.b32.xlu1 %v133_v14, 344  ;;  %112 = vbcast.lane.b32.xlu0 %v66_v13, 344 }
  0x5f   :  { %427 = vbcast.lane.b32.xlu1 %v405_v20, 296  ;;  %360 = vbcast.lane.b32.xlu0 %v338_v19, 296 }
  0x63   :  { %183 = vbcast.lane.b32.xlu1 %v133_v14, 352  ;;  %116 = vbcast.lane.b32.xlu0 %v66_v13, 352 }
  0x67   :  { %431 = vbcast.lane.b32.xlu1 %v405_v20, 304  ;;  %364 = vbcast.lane.b32.xlu0 %v338_v19, 304 }
  0x6b   :  { %187 = vbcast.lane.b32.xlu1 %v133_v14, 360  ;;  %120 = vbcast.lane.b32.xlu0 %v66_v13, 360 }
  0x6f   :  { %435 = vbcast.lane.b32.xlu1 %v405_v20, 312  ;;  %368 = vbcast.lane.b32.xlu0 %v338_v19, 312 }
  0x73   :  { %191 = vbcast.lane.b32.xlu1 %v133_v14, 368  ;;  %124 = vbcast.lane.b32.xlu0 %v66_v13, 368 }
  0x77   :  { %439 = vbcast.lane.b32.xlu1 %v405_v20, 320  ;;  %372 = vbcast.lane.b32.xlu0 %v338_v19, 320 }
  0x7b   :  { %195 = vbcast.lane.b32.xlu1 %v133_v14, 376  ;;  %128 = vbcast.lane.b32.xlu0 %v66_v13, 376 }
  0x7f   :  { %443 = vbcast.lane.b32.xlu1 %v405_v20, 328  ;;  %376 = vbcast.lane.b32.xlu0 %v338_v19, 328 }
  0x83   :  { %447 = vbcast.lane.b32.xlu1 %v405_v20, 336  ;;  %380 = vbcast.lane.b32.xlu0 %v338_v19, 336 }
  0x87   :  { %451 = vbcast.lane.b32.xlu1 %v405_v20, 344  ;;  %384 = vbcast.lane.b32.xlu0 %v338_v19, 344 }
  0x8b   :  { %455 = vbcast.lane.b32.xlu1 %v405_v20, 352  ;;  %388 = vbcast.lane.b32.xlu0 %v338_v19, 352 }
  0x8d   :  { %v136_v21 = vpop.permute.xlu1 %135  ;;  %v69_v22 = vpop.permute.xlu0 %68 }
  0x8e   :  { %v207_v35 = vsub.f32 %v69_v22, %v1007_v16  ;;  %v223_v37 = vsub.f32 %v136_v21, %v1010_v17 }
  0x8f   :  { %459 = vbcast.lane.b32.xlu1 %v405_v20, 360  ;;  %392 = vbcast.lane.b32.xlu0 %v338_v19, 360 }
  0x90   :  { %v239_v40 = vand.u32 2147483647, %v207_v35  ;;  %v255_v44 = vand.u32 2147483647, %v223_v37 }
  0x91   :  { %v140_v23 = vpop.permute.xlu1 %139  ;;  %v73_v24 = vpop.permute.xlu0 %72 }
  0x92   :  { %v208_v41 = vsub.f32 %v73_v24, %v1007_v16  ;;  %v271_v47 = vsub.f32 1.0, %v239_v40  ;;  %v224_v48 = vsub.f32 %v140_v23, %v1010_v17  ;;  %v287_v53 = vsub.f32 1.0, %v255_v44 }
  0x93   :  { %463 = vbcast.lane.b32.xlu1 %v405_v20, 368  ;;  %396 = vbcast.lane.b32.xlu0 %v338_v19, 368 }
  0x94   :  { %v240_v50 = vand.u32 2147483647, %v208_v41  ;;  %v303_v56 = vmax.f32 %v271_v47, 0.0  ;;  %v256_v57 = vand.u32 2147483647, %v224_v48  ;;  %v319_v8 = vmax.f32 %v287_v53, 0.0 }
  0x95   :  { %v144_v25 = vpop.permute.xlu1 %143  ;;  %v77_v26 = vpop.permute.xlu0 %76 }
  0x96   :  { %v209_v49 = vsub.f32 %v77_v26, %v1007_v16  ;;  %v225_v58 = vsub.f32 %v144_v25, %v1010_v17  ;;  %v272_v60 = vsub.f32 1.0, %v240_v50  ;;  %v288_v9 = vsub.f32 1.0, %v256_v57 }
  0x97   :  { %467 = vbcast.lane.b32.xlu1 %v405_v20, 376  ;;  %400 = vbcast.lane.b32.xlu0 %v338_v19, 376 }
  0x98   :  { %v241_v59 = vand.u32 2147483647, %v209_v49  ;;  %v257_v10 = vand.u32 2147483647, %v225_v58  ;;  %v304_v12 = vmax.f32 %v272_v60, 0.0  ;;  %v320_v23 = vmax.f32 %v288_v9, 0.0 }
  0x99   :  { %v148_v27 = vpop.permute.xlu1 %147  ;;  %v81_v28 = vpop.permute.xlu0 %80 }
  0x9a   :  { %v226_v63 = vsub.f32 %v148_v27, %v1010_v17  ;;  %v210_v1 = vsub.f32 %v81_v28, %v1007_v16  ;;  %v273_v11 = vsub.f32 1.0, %v241_v59  ;;  %v289_v24 = vsub.f32 1.0, %v257_v10 }
  0x9c   :  { %v258_v15 = vand.u32 2147483647, %v226_v63  ;;  %v242_v19 = vand.u32 2147483647, %v210_v1  ;;  %v305_v25 = vmax.f32 %v273_v11, 0.0  ;;  %v321_v42 = vmax.f32 %v289_v24, 0.0 }
  0x9d   :  { %v1017_v29 = vpop.permute.xlu1 %151  ;;  %v1019_v30 = vpop.permute.xlu0 %84 }
  0x9e   :  { %v290_v36 = vsub.f32 1.0, %v258_v15  ;;  %v274_v37 = vsub.f32 1.0, %v242_v19  ;;  %v227_v44 = vsub.f32 %v1017_v29, %v1010_v17 }
  0xa0   :  { %v322_v47 = vmax.f32 %v290_v36, 0.0  ;;  %v306_v48 = vmax.f32 %v274_v37, 0.0 }
  0xa1   :  { %v1021_v31 = vpop.permute.xlu1 %155  ;;  %v1023_v32 = vpop.permute.xlu0 %88 }
  0xa2   :  { %v228_v29 = vsub.f32 %v1021_v31, %v1010_v17 }
  0xa5   :  { %v1025_v33 = vpop.permute.xlu1 %159  ;;  %v1027_v34 = vpop.permute.xlu0 %92 }
  0xa6   :  { %v229_v19 = vsub.f32 %v1025_v33, %v1010_v17 }
  0xa9   :  { %v1033_v38 = vpop.permute.xlu1 %163  ;;  %v1035_v39 = vpop.permute.xlu0 %96 }
  0xaa   :  { %v230_v33 = vsub.f32 %v1033_v38, %v1010_v17 }
  0xad   :  { %v345_v45 = vpop.permute.xlu1 %344  ;;  %v341_v46 = vpop.permute.xlu0 %340 }
  0xae   :  { %v479_v52 = vmul.f32 %v1039_v43, %v341_v46  ;;  %v480_v2 = vmul.f32 %v1039_v43, %v345_v45  ;;  %v211_v45 = vsub.f32 %v1019_v30, %v1007_v16  ;;  %v212_v30 = vsub.f32 %v1023_v32, %v1007_v16 }
  0xb0   :  { %v511_v62 = vmul.f32 %v479_v52, %v303_v56  ;;  %v512_v22 = vmul.f32 %v480_v2, %v304_v12  ;;  %v259_v52 = vand.u32 2147483647, %v227_v44  ;;  %v243_v53 = vand.u32 2147483647, %v211_v45 }
  0xb1   :  { %v412_v54 = vpop.permute.xlu1 %411  ;;  %v408_v55 = vpop.permute.xlu0 %407  ;;  %v244_v63 = vand.u32 2147483647, %v212_v30 }
  0xb2   :  { %v495_v61 = vmul.f32 %v1044_v51, %v408_v55  ;;  %v496_v13 = vmul.f32 %v1044_v51, %v412_v54  ;;  %v291_v60 = vsub.f32 1.0, %v259_v52 }
  0xb4   :  { %v527_v14 = vmul.f32 %v495_v61, %v319_v8  ;;  %v528_v28 = vmul.f32 %v496_v13, %v320_v23  ;;  %v275_v61 = vsub.f32 1.0, %v243_v53  ;;  %v323_v8 = vmax.f32 %v291_v60, 0.0 }
  0xb5   :  { %v1052_v3 = vpop.permute.xlu1 %167  ;;  %v1054_v7 = vpop.permute.xlu0 %100  ;;  %v276_v13 = vsub.f32 1.0, %v244_v63 }
  0xb6   :  { %543 = vadd.xlane.f32.xlu0 %v511_v62  ;;  %v260_v62 = vand.u32 2147483647, %v228_v29  ;;  %v307_v9 = vmax.f32 %v275_v61, 0.0  ;;  %v231_v30 = vsub.f32 %v1052_v3, %v1010_v17  ;;  %v215_v60 = vsub.f32 %v1054_v7, %v1007_v16 }
  0xb8   :  { %v292_v12 = vsub.f32 1.0, %v260_v62 }
  0xb9   :  { %v416_v20 = vpop.permute.xlu1 %415  ;;  %v349_v21 = vpop.permute.xlu0 %348 }
  0xba   :  { %v481_v26 = vmul.f32 %v1039_v43, %v349_v21  ;;  %575 = vadd.xlane.f32.xlu0 %v527_v14  ;;  %v497_v27 = vmul.f32 %v1044_v51, %v416_v20  ;;  %v213_v20 = vsub.f32 %v1027_v34, %v1007_v16  ;;  %v324_v21 = vmax.f32 %v292_v12, 0.0 }
  0xbb   :  { %545 = vadd.xlane.f32.xlu1 %v512_v22  ;;  %v308_v22 = vmax.f32 %v276_v13, 0.0  ;;  %v214_v34 = vsub.f32 %v1035_v39, %v1007_v16 }
  0xbc   :  { %v513_v35 = vmul.f32 %v481_v26, %v305_v25  ;;  %v529_v46 = vmul.f32 %v497_v27, %v321_v42  ;;  %v261_v25 = vand.u32 2147483647, %v229_v19  ;;  %v245_v26 = vand.u32 2147483647, %v213_v20 }
  0xbd   :  { %v1059_v40 = vpop.permute.xlu1 %171  ;;  %v1061_v41 = vpop.permute.xlu0 %104 }
  0xbe   :  { %577 = vadd.xlane.f32.xlu0 %v528_v28  ;;  %v293_v44 = vsub.f32 1.0, %v261_v25  ;;  %v277_v45 = vsub.f32 1.0, %v245_v26  ;;  %v216_v7 = vsub.f32 %v1061_v41, %v1007_v16 }
  0xbf   :  { %547 = vadd.xlane.f32.xlu1 %v513_v35 }
  0xc0   :  { %v309_v52 = vmax.f32 %v277_v45, 0.0 }
  0xc1   :  { %v420_v49 = vpop.permute.xlu1 %419  ;;  %v353_v50 = vpop.permute.xlu0 %352 }
  0xc2   :  { %v498_v54 = vmul.f32 %v1044_v51, %v420_v49  ;;  %v482_v55 = vmul.f32 %v1039_v43, %v353_v50  ;;  %579 = vadd.xlane.f32.xlu0 %v529_v46  ;;  %v262_v46 = vand.u32 2147483647, %v230_v33  ;;  %v325_v50 = vmax.f32 %v293_v44, 0.0 }
  0xc4   :  { %v514_v56 = vmul.f32 %v482_v55, %v306_v48  ;;  %v530_v57 = vmul.f32 %v498_v54, %v322_v47  ;;  %v246_v47 = vand.u32 2147483647, %v214_v34  ;;  %v294_v55 = vsub.f32 1.0, %v262_v46 }
  0xc5   :  { %v1073_v58 = vpop.permute.xlu1 %175  ;;  %v1075_v59 = vpop.permute.xlu0 %108 }
  0xc6   :  { %549 = vadd.xlane.f32.xlu1 %v514_v56  ;;  %581 = vadd.xlane.f32.xlu0 %v530_v57  ;;  %v278_v56 = vsub.f32 1.0, %v246_v47  ;;  %v326_v61 = vmax.f32 %v294_v55, 0.0 }
  0xc8   :  { %v310_v62 = vmax.f32 %v278_v56, 0.0 }
  0xc9   :  { %v424_v1 = vpop.permute.xlu1 %423  ;;  %v357_v2 = vpop.permute.xlu0 %356 }
  0xca   :  { %v499_v10 = vmul.f32 %v1044_v51, %v424_v1  ;;  %v483_v31 = vmul.f32 %v1039_v43, %v357_v2  ;;  %v263_v2 = vand.u32 2147483647, %v231_v30 }
  0xcc   :  { %v515_v11 = vmul.f32 %v483_v31, %v307_v9  ;;  %v531_v32 = vmul.f32 %v499_v10, %v323_v8  ;;  %v247_v8 = vand.u32 2147483647, %v215_v60  ;;  %v232_v31 = vsub.f32 %v1059_v40, %v1010_v17 }
  0xcd   :  { %v1079_v14 = vpop.permute.xlu1 %179  ;;  %v1081_v15 = vpop.permute.xlu0 %112  ;;  %v295_v13 = vsub.f32 1.0, %v263_v2  ;;  %v217_v40 = vsub.f32 %v1075_v59, %v1007_v16 }
  0xce   :  { %551 = vadd.xlane.f32.xlu1 %v515_v11  ;;  %583 = vadd.xlane.f32.xlu0 %v531_v32  ;;  %v279_v19 = vsub.f32 1.0, %v247_v8  ;;  %v264_v20 = vand.u32 2147483647, %v232_v31  ;;  %v218_v46 = vsub.f32 %v1081_v15, %v1007_v16 }
  0xcf   :  { %v327_v25 = vmax.f32 %v295_v13, 0.0  ;;  %v249_v44 = vand.u32 2147483647, %v217_v40 }
  0xd0   :  { %v311_v41 = vmax.f32 %v279_v19, 0.0 }
  0xd1   :  { %v428_v23 = vpop.permute.xlu1 %427  ;;  %v361_v24 = vpop.permute.xlu0 %360 }
  0xd2   :  { %v500_v27 = vmul.f32 %v1044_v51, %v428_v23  ;;  %v484_v28 = vmul.f32 %v1039_v43, %v361_v24 }
  0xd4   :  { %v516_v35 = vmul.f32 %v484_v28, %v308_v22  ;;  %v532_v36 = vmul.f32 %v500_v27, %v324_v21  ;;  %v248_v21 = vand.u32 2147483647, %v216_v7  ;;  %v233_v22 = vsub.f32 %v1073_v58, %v1010_v17 }
  0xd5   :  { %v1093_v37 = vpop.permute.xlu1 %183  ;;  %v1095_v42 = vpop.permute.xlu0 %116  ;;  %v296_v28 = vsub.f32 1.0, %v264_v20  ;;  %v234_v58 = vsub.f32 %v1079_v14, %v1010_v17  ;;  %v250_v14 = vand.u32 2147483647, %v218_v46 }
  0xd6   :  { %553 = vadd.xlane.f32.xlu1 %v516_v35  ;;  %585 = vadd.xlane.f32.xlu0 %v532_v36  ;;  %v280_v33 = vsub.f32 1.0, %v248_v21  ;;  %v265_v34 = vand.u32 2147483647, %v233_v22 }
  0xd7   :  { %v328_v47 = vmax.f32 %v296_v28, 0.0 }
  0xd9   :  { %v432_v48 = vpop.permute.xlu1 %431  ;;  %v365_v49 = vpop.permute.xlu0 %364 }
  0xda   :  { %v501_v53 = vmul.f32 %v1044_v51, %v432_v48  ;;  %v485_v38 = vmul.f32 %v1039_v43, %v365_v49  ;;  %v235_v48 = vsub.f32 %v1093_v37, %v1010_v17  ;;  %v312_v49 = vmax.f32 %v280_v33, 0.0 }
  0xdc   :  { %v517_v54 = vmul.f32 %v485_v38, %v309_v52  ;;  %v533_v39 = vmul.f32 %v501_v53, %v325_v50  ;;  %v297_v50 = vsub.f32 1.0, %v265_v34  ;;  %v281_v52 = vsub.f32 1.0, %v249_v44 }
  0xdd   :  { %v1099_v57 = vpop.permute.xlu1 %187  ;;  %v1101_v29 = vpop.permute.xlu0 %120  ;;  %v266_v53 = vand.u32 2147483647, %v234_v58  ;;  %v267_v56 = vand.u32 2147483647, %v235_v48 }
  0xde   :  { %555 = vadd.xlane.f32.xlu1 %v517_v54  ;;  %587 = vadd.xlane.f32.xlu0 %v533_v39  ;;  %v219_v39 = vsub.f32 %v1095_v42, %v1007_v16  ;;  %v236_v30 = vsub.f32 %v1099_v57, %v1010_v17 }
  0xe0   :  { %v251_v42 = vand.u32 2147483647, %v219_v39  ;;  %v268_v57 = vand.u32 2147483647, %v236_v30 }
  0xe1   :  { %v436_v63 = vpop.permute.xlu1 %435  ;;  %v369_v1 = vpop.permute.xlu0 %368 }
  0xe2   :  { %v502_v9 = vmul.f32 %v1044_v51, %v436_v63  ;;  %v486_v10 = vmul.f32 %v1039_v43, %v369_v1  ;;  %v298_v63 = vsub.f32 1.0, %v266_v53  ;;  %v220_v1 = vsub.f32 %v1101_v29, %v1007_v16 }
  0xe4   :  { %v518_v11 = vmul.f32 %v486_v10, %v310_v62  ;;  %v534_v3 = vmul.f32 %v502_v9, %v326_v61  ;;  %v329_v61 = vmax.f32 %v297_v50, 0.0  ;;  %v313_v62 = vmax.f32 %v281_v52, 0.0 }
  0xe5   :  { %v1113_v32 = vpop.permute.xlu1 %191  ;;  %v1115_v12 = vpop.permute.xlu0 %124  ;;  %v282_v9 = vsub.f32 1.0, %v250_v14  ;;  %v330_v13 = vmax.f32 %v298_v63, 0.0  ;;  %v252_v19 = vand.u32 2147483647, %v220_v1 }
  0xe6   :  { %557 = vadd.xlane.f32.xlu1 %v518_v11  ;;  %589 = vadd.xlane.f32.xlu0 %v534_v3  ;;  %v299_v11 = vsub.f32 1.0, %v267_v56  ;;  %v237_v20 = vsub.f32 %v1113_v32, %v1010_v17  ;;  %v221_v29 = vsub.f32 %v1115_v12, %v1007_v16 }
  0xe7   :  { %v314_v40 = vmax.f32 %v282_v9, 0.0 }
  0xe8   :  { %v253_v32 = vand.u32 2147483647, %v221_v29 }
  0xe9   :  { %v440_v23 = vpop.permute.xlu1 %439  ;;  %v373_v24 = vpop.permute.xlu0 %372 }
  0xea   :  { %v503_v26 = vmul.f32 %v1044_v51, %v440_v23  ;;  %v487_v27 = vmul.f32 %v1039_v43, %v373_v24  ;;  %v283_v23 = vsub.f32 1.0, %v251_v42 }
  0xec   :  { %v519_v35 = vmul.f32 %v487_v27, %v311_v41  ;;  %v535_v36 = vmul.f32 %v503_v26, %v327_v25  ;;  %v331_v41 = vmax.f32 %v299_v11, 0.0  ;;  %v300_v26 = vsub.f32 1.0, %v268_v57 }
  0xed   :  { %v1125_v45 = vpop.permute.xlu1 %195  ;;  %v1127_v59 = vpop.permute.xlu0 %128  ;;  %v315_v44 = vmax.f32 %v283_v23, 0.0 }
  0xee   :  { %559 = vadd.xlane.f32.xlu1 %v519_v35  ;;  %591 = vadd.xlane.f32.xlu0 %v535_v36  ;;  %v284_v35 = vsub.f32 1.0, %v252_v19  ;;  %v269_v36 = vand.u32 2147483647, %v237_v20  ;;  %v238_v12 = vsub.f32 %v1125_v45, %v1010_v17  ;;  %v222_v58 = vsub.f32 %v1127_v59, %v1007_v16 }
  0xef   :  { %v332_v50 = vmax.f32 %v300_v26, 0.0 }
  0xf0   :  { %v316_v52 = vmax.f32 %v284_v35, 0.0  ;;  %v301_v53 = vsub.f32 1.0, %v269_v36  ;;  %v270_v45 = vand.u32 2147483647, %v238_v12  ;;  %v254_v14 = vand.u32 2147483647, %v222_v58 }
  0xf1   :  { %v444_v38 = vpop.permute.xlu1 %443  ;;  %v377_v54 = vpop.permute.xlu0 %376 }
  0xf2   :  { %v504_v55 = vmul.f32 %v1044_v51, %v444_v38  ;;  %v488_v15 = vmul.f32 %v1039_v43, %v377_v54  ;;  %v285_v38 = vsub.f32 1.0, %v253_v32  ;;  %v640_v32 = vand.u32 127, %v49_v0 }
  0xf4   :  { %v520_v60 = vmul.f32 %v488_v15, %v312_v49  ;;  %v536_v37 = vmul.f32 %v504_v55, %v328_v47  ;;  %v333_v15 = vmax.f32 %v301_v53, 0.0  ;;  %v317_v56 = vmax.f32 %v285_v38, 0.0 }
  0xf5   :  { %v448_v2 = vpop.permute.xlu1 %447  ;;  %v381_v8 = vpop.permute.xlu0 %380  ;;  %v659_v58 = vadd.s32 4294967272, %v640_v32  ;;  %v673_v0 = vadd.s32 4294967256, %v640_v32  ;;  %v680_v53 = vadd.s32 4294967248, %v640_v32  ;;  %v687_v38 = vadd.s32 4294967240, %v640_v32 }
  0xf6   :  { %v505_v10 = vmul.f32 %v1044_v51, %v448_v2  ;;  %v489_v31 = vmul.f32 %v1039_v43, %v381_v8  ;;  %561 = vadd.xlane.f32.xlu1 %v520_v60  ;;  %593 = vadd.xlane.f32.xlu0 %v536_v37  ;;  %v302_v37 = vsub.f32 1.0, %v270_v45  ;;  %v33_v8 = vsub.f32 %v991_v5, %v993_v6 }
  0xf7   :  { %v30_v5 = vsel %vm29_vm0, %v1012_v18, 0.0  ;;  %v701_v45 = vadd.s32 4294967224, %v640_v32 }
  0xf8   :  { %v521_v3 = vmul.f32 %v489_v31, %v313_v62  ;;  %v537_v7 = vmul.f32 %v505_v10, %v329_v61  ;;  %v286_v61 = vsub.f32 1.0, %v254_v14  ;;  %v334_v10 = vmax.f32 %v302_v37, 0.0 }
  0xf9   :  { %v452_v21 = vpop.permute.xlu1 %451  ;;  %v385_v22 = vpop.permute.xlu0 %384  ;;  %v690_v37 = vsub.s32 %v687_v38, %v989_v4 }
  0xfa   :  { %v506_v24 = vmul.f32 %v1044_v51, %v452_v21  ;;  %v490_v25 = vmul.f32 %v1039_v43, %v385_v22  ;;  %563 = vadd.xlane.f32.xlu1 %v521_v3  ;;  %595 = vadd.xlane.f32.xlu0 %v537_v7  ;;  %v318_v31 = vmax.f32 %v286_v61, 0.0  ;;  %v34_v3 = vmul.f32 0.5, %v33_v8 }
  0xfc   :  { %v522_v27 = vmul.f32 %v490_v25, %v314_v40  ;;  %v538_v28 = vmul.f32 %v506_v24, %v330_v13  ;;  %v35_v19 = vmul.f32 %v34_v3, %v33_v8  ;;  %v743_v8 = vadd.s32 4294967176, %v640_v32 }
  0xfd   :  { %v456_v33 = vpop.permute.xlu1 %455  ;;  %v389_v34 = vpop.permute.xlu0 %388 }
  0xfe   :  { %v507_v46 = vmul.f32 %v1044_v51, %v456_v33  ;;  %v491_v47 = vmul.f32 %v1039_v43, %v389_v34  ;;  %565 = vadd.xlane.f32.xlu1 %v522_v27  ;;  %597 = vadd.xlane.f32.xlu0 %v538_v28  ;;  %v36_v6 = vmul.f32 %v35_v19, %v1012_v18  ;;  %v645_v34 = vadd.s32 4294967288, %v640_v32 }
 0x100   :  { %v523_v48 = vmul.f32 %v491_v47, %v315_v44  ;;  %v539_v49 = vmul.f32 %v507_v46, %v331_v41  ;;  %v37_v20 = vsel %vm29_vm0, %v36_v6, 0.0  ;;  %v652_v44 = vadd.s32 4294967280, %v640_v32 }
 0x101   :  { %v460_v54 = vpop.permute.xlu1 %459  ;;  %v393_v17 = vpop.permute.xlu0 %392 }
 0x102   :  { %v508_v39 = vmul.f32 %v1044_v51, %v460_v54  ;;  %v492_v16 = vmul.f32 %v1039_v43, %v393_v17  ;;  %567 = vadd.xlane.f32.xlu1 %v523_v48  ;;  %599 = vadd.xlane.f32.xlu0 %v539_v49  ;;  %v643_v48 = vsub.s32 %v640_v32, %v989_v4  ;;  %v694_v17 = vadd.s32 4294967232, %v640_v32 }
 0x103   :  { %v648_v49 = vsub.s32 %v645_v34, %v989_v4  ;;  %v662_v54 = vsub.s32 %v659_v58, %v989_v4 }
 0x104   :  { %v524_v59 = vmul.f32 %v492_v16, %v316_v52  ;;  %v540_v55 = vmul.f32 %v508_v39, %v332_v50  ;;  %v666_v50 = vadd.s32 4294967264, %v640_v32  ;;  %v655_v52 = vsub.s32 %v652_v44, %v989_v4 }
 0x105   :  { %v464_v30 = vpop.permute.xlu1 %463  ;;  %v397_v60 = vpop.permute.xlu0 %396  ;;  %v708_v16 = vadd.s32 4294967216, %v640_v32  ;;  %v1221_v61 = vsub.s32 %v694_v17, %v989_v4 }
 0x106   :  { %v509_v62 = vmul.f32 %v1044_v51, %v464_v30  ;;  %v493_v63 = vmul.f32 %v1039_v43, %v397_v60  ;;  %569 = vadd.xlane.f32.xlu1 %v524_v59  ;;  %601 = vadd.xlane.f32.xlu0 %v540_v55  ;;  %v715_v59 = vadd.s32 4294967208, %v640_v32  ;;  %v669_v55 = vsub.s32 %v666_v50, %v989_v4 }
 0x107   :  { %v676_v30 = vsub.s32 %v673_v0, %v989_v4  ;;  %v683_v60 = vsub.s32 %v680_v53, %v989_v4 }
 0x108   :  { %v525_v1 = vmul.f32 %v493_v63, %v317_v56  ;;  %v541_v2 = vmul.f32 %v509_v62, %v333_v15  ;;  %v722_v15 = vadd.s32 4294967200, %v640_v32  ;;  %v729_v56 = vadd.s32 4294967192, %v640_v32 }
 0x109   :  { %v468_v9 = vpop.permute.xlu1 %467  ;;  %v401_v42 = vpop.permute.xlu0 %400  ;;  %v1224_v62 = vsub.s32 %v701_v45, %v989_v4 }
 0x10a   :  { %v510_v11 = vmul.f32 %v1044_v51, %v468_v9  ;;  %v494_v57 = vmul.f32 %v1039_v43, %v401_v42  ;;  %571 = vadd.xlane.f32.xlu1 %v525_v1  ;;  %603 = vadd.xlane.f32.xlu0 %v541_v2  ;;  %v736_v2 = vadd.s32 4294967184, %v640_v32  ;;  %v1241_v3 = vsub.s32 %v722_v15, %v989_v4 }
 0x10b   :  { %v1256_v32 = vsub.s32 %v743_v8, %v989_v4 }
 0x10c   :  { %v526_v7 = vmul.f32 %v494_v57, %v318_v31  ;;  %v542_v13 = vmul.f32 %v510_v11, %v334_v10  ;;  %v1233_v10 = vsub.s32 %v708_v16, %v989_v4  ;;  %v1236_v31 = vsub.s32 %v715_v59, %v989_v4 }
 0x10e   :  { %573 = vadd.xlane.f32.xlu1 %v526_v7  ;;  %605 = vadd.xlane.f32.xlu0 %v542_v13  ;;  %v1244_v7 = vsub.s32 %v729_v56, %v989_v4 }
 0x112   :  { %31 = vadd.xlane.f32.xlu1 %v30_v5 }
 0x116   :  { %38 = vadd.xlane.f32.xlu1 %v37_v20 }
 0x143   :  { %v1167_v51 = vpop.xlane.xlu0 %543 }
 0x144   :  { %v644_v13 = vrot.slane %v1167_v51, %v643_v48 }
 0x147   :  { %v1169_v43 = vpop.xlane.xlu0 %575 }
 0x148   :  { %v1173_v21 = vpop.xlane.xlu1 %545  ;;  %v753_v19 = vrot.slane %v1169_v43, %v643_v48 }
 0x149   :  { %v649_v9 = vrot.slane %v1173_v21, %v648_v49 }
 0x14b   :  { %v1171_v29 = vpop.xlane.xlu0 %577  ;;  %v651_v51 = vsel %vm650_vm1, %v649_v9, %v644_v13 }
 0x14c   :  { %v1177_v40 = vpop.xlane.xlu1 %547  ;;  %v757_v42 = vrot.slane %v1171_v29, %v648_v49 }
 0x14d   :  { %v656_v11 = vrot.slane %v1177_v40, %v655_v52  ;;  %v1253_v40 = vsub.s32 %v736_v2, %v989_v4 }
 0x14e   :  { %v758_v43 = vsel %vm650_vm1, %v757_v42, %v753_v19  ;;  %vm829_vm1 = vcmask 1041409  }
 0x14f   :  { %v1175_v22 = vpop.xlane.xlu0 %579 }
 0x150   :  { %v762_v57 = vrot.slane %v1175_v22, %v655_v52 }
 0x153   :  { %v1179_v23 = vpop.xlane.xlu1 %549  ;;  %v1181_v24 = vpop.xlane.xlu0 %581 }
 0x154   :  { %v663_v5 = vrot.slane %v1179_v23, %v662_v54  ;;  %v767_v6 = vrot.slane %v1181_v24, %v662_v54 }
 0x15b   :  { %v1183_v18 = vpop.xlane.xlu1 %551  ;;  %v1185_v25 = vpop.xlane.xlu0 %583 }
 0x15c   :  { %v670_v20 = vrot.slane %v1183_v18, %v669_v55  ;;  %v772_v29 = vrot.slane %v1185_v25, %v669_v55  ;;  %v658_v18 = vsel %vm657_vm2, %v656_v11, %v651_v51  ;;  %v763_v25 = vsel %vm657_vm2, %v762_v57, %v758_v43 }
 0x15d   :  { %v665_v4 = vsel %vm664_vm3, %v663_v5, %v658_v18  ;;  %v768_v58 = vsel %vm664_vm3, %v767_v6, %v763_v25 }
 0x15e   :  { %v773_v49 = vsel %vm671_vm4, %v772_v29, %v768_v58 }
 0x163   :  { %v1187_v41 = vpop.xlane.xlu1 %553  ;;  %v1189_v26 = vpop.xlane.xlu0 %585 }
 0x164   :  { %v677_v23 = vrot.slane %v1187_v41, %v676_v30  ;;  %v777_v24 = vrot.slane %v1189_v26, %v676_v30  ;;  %v672_v26 = vsel %vm671_vm4, %v670_v20, %v665_v4 }
 0x166   :  { %v679_v0 = vsel %vm678_vm5, %v677_v23, %v672_v26  ;;  %v778_v53 = vsel %vm678_vm5, %v777_v24, %v773_v49 }
 0x16b   :  { %v1191_v27 = vpop.xlane.xlu1 %555  ;;  %v1193_v28 = vpop.xlane.xlu0 %587 }
 0x16c   :  { %v684_v34 = vrot.slane %v1191_v27, %v683_v60  ;;  %v782_v44 = vrot.slane %v1193_v28, %v683_v60 }
 0x16e   :  { %v686_v38 = vsel %vm685_vm6, %v684_v34, %v679_v0  ;;  %v783_v54 = vsel %vm685_vm6, %v782_v44, %v778_v53 }
 0x173   :  { %v1195_v35 = vpop.xlane.xlu1 %557  ;;  %v1197_v36 = vpop.xlane.xlu0 %589 }
 0x174   :  { %v691_v48 = vrot.slane %v1195_v35, %v690_v37  ;;  %v787_v41 = vrot.slane %v1197_v36, %v690_v37 }
 0x176   :  { %v693_v17 = vsel %vm692_vm7, %v691_v48, %v686_v38  ;;  %v788_v45 = vsel %vm692_vm7, %v787_v41, %v783_v54 }
 0x17b   :  { %v1200_v12 = vpop.xlane.xlu1 %559  ;;  %v1202_v33 = vpop.xlane.xlu0 %591 }
 0x17c   :  { %v698_v50 = vrot.slane %v1200_v12, %v1221_v61  ;;  %v792_v27 = vrot.slane %v1202_v33, %v1221_v61 }
 0x17e   :  { %v700_v16 = vsel %vm699_vm8, %v698_v50, %v693_v17  ;;  %v793_v59 = vsel %vm699_vm8, %v792_v27, %v788_v45 }
 0x183   :  { %v1204_v46 = vpop.xlane.xlu1 %561  ;;  %v1206_v47 = vpop.xlane.xlu0 %593 }
 0x184   :  { %v705_v35 = vrot.slane %v1204_v46, %v1224_v62  ;;  %v797_v36 = vrot.slane %v1206_v47, %v1224_v62 }
 0x186   :  { %v707_v56 = vsel %vm706_vm9, %v705_v35, %v700_v16  ;;  %v798_v30 = vsel %vm706_vm9, %v797_v36, %v793_v59 }
 0x187   :  { %v1212_v14 = vpop.xlane.xlu1 %563  ;;  %v1214_v39 = vpop.xlane.xlu0 %595 }
 0x188   :  { %v712_v12 = vrot.slane %v1212_v14, %v1233_v10  ;;  %v802_v33 = vrot.slane %v1214_v39, %v1233_v10 }
 0x18a   :  { %v714_v61 = vsel %vm713_vm10, %v712_v12, %v707_v56  ;;  %v803_v62 = vsel %vm713_vm10, %v802_v33, %v798_v30 }
 0x18b   :  { %v1226_v63 = vpop.xlane.xlu1 %565  ;;  %v1228_v1 = vpop.xlane.xlu0 %597 }
 0x18c   :  { %v719_v46 = vrot.slane %v1226_v63, %v1236_v31  ;;  %v807_v47 = vrot.slane %v1228_v1, %v1236_v31 }
 0x18e   :  { %v721_v2 = vsel %vm720_vm11, %v719_v46, %v714_v61  ;;  %v808_v8 = vsel %vm720_vm11, %v807_v47, %v803_v62 }
 0x18f   :  { %v568_v21 = vpop.xlane.xlu1 %567  ;;  %v600_v22 = vpop.xlane.xlu0 %599 }
 0x190   :  { %v726_v55 = vrot.slane %v568_v21, %v1241_v3  ;;  %v812_v14 = vrot.slane %v600_v22, %v1241_v3 }
 0x192   :  { %v728_v9 = vsel %vm727_vm12, %v726_v55, %v721_v2  ;;  %v813_v42 = vsel %vm727_vm12, %v812_v14, %v808_v8 }
 0x193   :  { %v570_v28 = vpop.xlane.xlu1 %569  ;;  %v602_v52 = vpop.xlane.xlu0 %601 }
 0x194   :  { %v733_v60 = vrot.slane %v570_v28, %v1244_v7  ;;  %v817_v37 = vrot.slane %v602_v52, %v1244_v7 }
 0x196   :  { %v735_v11 = vsel %vm734_vm13, %v733_v60, %v728_v9  ;;  %v818_v57 = vsel %vm734_vm13, %v817_v37, %v813_v42 }
 0x197   :  { %v572_v15 = vpop.xlane.xlu1 %571  ;;  %v604_v39 = vpop.xlane.xlu0 %603 }
 0x198   :  { %v740_v63 = vrot.slane %v572_v15, %v1253_v40  ;;  %v822_v1 = vrot.slane %v604_v39, %v1253_v40 }
 0x19a   :  { %v742_v13 = vsel %vm741_vm14, %v740_v63, %v735_v11  ;;  %v823_v19 = vsel %vm741_vm14, %v822_v1, %v818_v57 }
 0x19b   :  { %v574_v10 = vpop.xlane.xlu1 %573  ;;  %v606_v31 = vpop.xlane.xlu0 %605 }
 0x19c   :  { %v747_v3 = vrot.slane %v574_v10, %v1256_v32  ;;  %v827_v7 = vrot.slane %v606_v31, %v1256_v32 }
 0x19e   :  { %v749_v5 = vsel %vm748_vm15, %v747_v3, %v742_v13  ;;  %v828_v6 = vsel %vm748_vm15, %v827_v7, %v823_v19 }
 0x19f   :  { %v830_v20 = vsel %vm829_vm1, %v828_v6, %v749_v5  ;;  %v32_v29 = vpop.xlane.xlu1 %31 }
 0x1a0   :  { %v832_v21 = vsel %vm29_vm0, %v830_v20, 0.0  ;;  %v41_v22 = vmax.f32 %v32_v29, 1.0  ;;  %vm40_vm2 = vcmp.gt.f32.partialorder %v32_v29, 0.0 }
 0x1a1   :  { %833 = vadd.xlane.f32.xlu0 %v832_v21 }
 0x1a2   :  { %881 = vrcp.f32 %v41_v22 }
 0x1a3   :  { %v39_v40 = vpop.xlane.xlu1 %38 }
 0x1ac   :  { %v882_v51 = vpop.eup %881 }
 0x1ad   :  { %v43_v43 = vmul.f32 %v882_v51, %v39_v40 }
 0x1af   :  { %v44_v23 = vsel %vm40_vm2, %v43_v43, 0.0 }
 0x1b0   :  { %v843_v24 = vmul.f32 0.25, %v44_v23 }
 0x1b2   :  { %844 = vst [vmem:[#allocation5] sm:$0x3] %v843_v24 }
 0x1b3   :  { %918 = shalt.err (!%p915_p12)
}
 0x1b4   :  { %s919_s25 = scalar_lea.hbm %s1340_s1, 32 }
 0x1b5   :  { %p920_p13 = scmp.ne.s32.totalorder %s1340_s1, %s919_s25  ;;  %p923_p0 = scmp.lt.u32.totalorder %s919_s25, %s1340_s1 }
 0x1b7   :  { %p925_p1 = pnand %p923_p0, %p920_p13 }
 0x1b9   :  { %928 = shalt.err (!%p925_p1)
}
 0x1ba   :  { %856 = dma.vmem_to_hbm [thread:$0]  %s854_s21, 32, %s1340_s1, [#allocation4]   ;;  %v876_v32 = vadd.f32 -1.0, %v32_v29  ;;  %vm838_vm0 = vcmp.gt.f32.partialorder %v32_v29, 1.0 }
 0x1bb   :  { %s960_s4 = smov [#allocation6]  }
 0x1bc   :  { %v837_v18 = vmul.f32 %v876_v32, %v32_v29  ;;  %s863_s5 = sshll.u32 %s960_s4, 4  ;;  %s864_s5 = int_to_ptr.vmem [resolvable:$true] %s863_s5 }
 0x1bd   :  { %s929_s6 = scalar_lea.vmem %s864_s5, 32  ;;  %p934_p3 = scmp.lt.s32.totalorder %s864_s5, %s864_s5 }
 0x1be   :  { %v839_v25 = vmax.f32 %v837_v18, 1.0  ;;  %p930_p2 = scmp.ne.s32.totalorder %s864_s5, %s929_s6  ;;  %p935_p4 = scmp.lt.s32.totalorder %s929_s6, %s929_s6 }
 0x1c0   :  { %883 = vrcp.f32 %v839_v25  ;;  %p936_p5 = por %p935_p4, %p934_p3 }
 0x1c2   :  { %p937_p6 = pnand %p936_p5, %p930_p2 }
 0x1ca   :  { %v884_v4 = vpop.eup %883 }
 0x22e   :  { %v834_v34 = vpop.xlane.xlu0 %833 }
 0x22f   :  { %v835_v44 = vsub.f32 %v834_v34, %v32_v29 }
 0x231   :  { %v841_v58 = vmul.f32 %v884_v4, %v835_v44 }
 0x233   :  { %v842_v48 = vsel %vm838_vm0, %v841_v58, 0.0 }
 0x234   :  { %v845_v41 = vmul.f32 0.25, %v842_v48 }
 0x236   :  { %846 = vst [vmem:[#allocation6] sm:$0x3] %v845_v41 }
 0x237   :  { %940 = shalt.err (!%p937_p6)
}
 0x238   :  { %s941_s8 = scalar_lea.hbm %s1341_s2, 32 }
 0x239   :  { %p942_p7 = scmp.ne.s32.totalorder %s1341_s2, %s941_s8  ;;  %p945_p8 = scmp.lt.u32.totalorder %s941_s8, %s1341_s2 }
 0x23b   :  { %p947_p9 = pnand %p945_p8, %p942_p7 }
 0x23d   :  { %950 = shalt.err (!%p947_p9)
}
 0x23e   :  { %866 = dma.vmem_to_hbm [thread:$0]  %s864_s5, 32, %s1341_s2, [#allocation7]  }
 0x23f   :  { %953 = dma.done.wait [#allocation4], 32  }
 0x240   :  { %954 = vsyncadd [#allocation4], 4294967264 }
 0x241   :  { %955 = dma.done.wait [#allocation7], 32  }
 0x242   :  { %956 = vsyncadd [#allocation7], 4294967264 }
 0x243   :  { %873 = vsyncpa [#allocation3], 1 }
 0x244   :  { %874 = vsyncpa [#allocation4], 1 }
 0x245   :  { %875 = vsyncpa [#allocation7], 1 }

</bundles_post_ra>
